<compile_context>
chip_gen: v7x
topology: tpu7x:2x2x1
jax: 0.10.0
libtpu: 0.0.40
codegen_flags: <defaults>
</compile_context>

<pallas_src>
import functools

import jax
import jax.numpy as jnp
import numpy as np
from jax.experimental import pallas as pl
from jax.experimental.pallas import tpu as pltpu


def make_gaussian_kernel(k: int = 3, sigma: float = 1.0):
    """Normalized k x k Gaussian kernel (nested Python floats), as the module expects."""
    assert k % 2 == 1, "kernel size must be odd."
    ax = np.arange(k, dtype=np.float64) - (k - 1) / 2.0
    g1 = np.exp(-(ax ** 2) / (2.0 * sigma ** 2))
    g2 = np.outer(g1, g1)
    g2 = g2 / g2.sum()
    return tuple(tuple(float(v) for v in row) for row in g2)


def _separate_kernel(kernel2d):
    """Factor a separable (rank-1) 2D kernel into (row_taps, col_taps)."""
    w2 = np.asarray(kernel2d, dtype=np.float64)
    k = w2.shape[0]
    assert w2.shape == (k, k) and k % 2 == 1, "kernel must be square and odd."
    u, s, vt = np.linalg.svd(w2)
    g_row = u[:, 0] * np.sqrt(s[0])
    g_col = vt[0, :] * np.sqrt(s[0])
    if g_row.sum() < 0:  # fix sign (Gaussian taps are positive)
        g_row, g_col = -g_row, -g_col
    assert np.allclose(np.outer(g_row, g_col), w2, atol=1e-6), (
        "GaussianBlur kernel is expected to be separable (rank-1).")
    return (tuple(float(v) for v in g_row),   # vertical taps (over H)
            tuple(float(v) for v in g_col))   # horizontal taps (over W)


def _tree_sum(terms):
    """Balanced pairwise sum -> shorter VALU dependency chain."""
    terms = list(terms)
    while len(terms) > 1:
        nxt = [a + b for a, b in zip(terms[::2], terms[1::2])]
        if len(terms) % 2:
            nxt.append(terms[-1])
        terms = nxt
    return terms[0]


def _blur_kernel_body(x_ref, o_ref, s1_ref, s2_ref, *, w_row, w_col):
    # x_ref/o_ref: (Bc, H, W) f32.  s1_ref: (Bc, H, W+2p).  s2_ref: (Bc, H+2p, W).
    Bc, H, W = o_ref.shape
    k = len(w_col)
    p = k // 2

    # ---- horizontal (lane-axis) 1-D pass: zero column halos, fill centre ----
    zcol = jnp.zeros((Bc, H, p), dtype=jnp.float32)
    s1_ref[:, :, 0:p] = zcol
    s1_ref[:, :, p + W:p + W + p] = zcol
    s1_ref[:, :, p:p + W] = x_ref[...]

    h_acc = _tree_sum(w_col[j] * s1_ref[:, :, j:j + W] for j in range(k))

    # ---- vertical (sublane-axis) 1-D pass: zero row halos, fill centre ----
    zrow = jnp.zeros((Bc, p, W), dtype=jnp.float32)
    s2_ref[:, 0:p, :] = zrow
    s2_ref[:, p + H:p + H + p, :] = zrow
    s2_ref[:, p:p + H, :] = h_acc

    o_ref[...] = _tree_sum(w_row[i] * s2_ref[:, i:i + H, :] for i in range(k))


def gaussian_blur(x, kernel2d, *, vmem_budget_bytes=20 * 1024 * 1024):
    """x: (N, C>=3, H, W) float32.  Returns (N, 3, H, W) float32."""
    N, C, H, W = x.shape
    assert C >= 3, "GaussianBlur forward uses channels 0, 1, 2."
    w_row, w_col = _separate_kernel(kernel2d)
    k = len(w_row)
    p = k // 2

    P = N * 3
    # Planes go straight in (no host-side padding / extra HBM round-trip).
    xf = x[:, :3].astype(jnp.float32).reshape(P, H, W)

    # Pick Bc (planes per grid step): largest divisor of P whose VMEM
    # footprint (double-buffered in+out blocks + the two padded scratches)
    # fits the budget.  Budget is conservative for v7x's 64 MiB VMEM.
    per_plane_bytes = (2 * 2 * H * W * 4
                       + (H * (W + 2 * p) + (H + 2 * p) * W) * 4)
    max_bc = max(1, vmem_budget_bytes // per_plane_bytes)
    bc = max(d for d in range(1, P + 1) if P % d == 0 and d <= max_bc)

    body = functools.partial(_blur_kernel_body, w_row=w_row, w_col=w_col)

    cost = pl.CostEstimate(
        flops=2 * 2 * k * P * H * W,          # two separable passes, k mul+add each
        transcendentals=0,
        bytes_accessed=2 * P * H * W * 4,     # one read + one write of the planes
    )

    out = pl.pallas_call(
        body,
        out_shape=jax.ShapeDtypeStruct((P, H, W), jnp.float32),
        grid=(P // bc,),
        in_specs=[pl.BlockSpec((bc, H, W), lambda b: (b, 0, 0))],
        out_specs=pl.BlockSpec((bc, H, W), lambda b: (b, 0, 0)),
        scratch_shapes=[
            pltpu.VMEM((bc, H, W + 2 * p), jnp.float32),   # col-padded input
            pltpu.VMEM((bc, H + 2 * p, W), jnp.float32),   # row-padded mid result
        ],
        compiler_params=pltpu.CompilerParams(
            dimension_semantics=("parallel",),             # planes independent (2 TCs on v7x)
            vmem_limit_bytes=32 * 1024 * 1024,
        ),
        cost_estimate=cost,
    )(xf)

    return out.reshape(N, 3, H, W)


def _reference_blur(x, kernel2d):
    """Pure-JAX reference (lax conv) for verification."""
    N, C, H, W = x.shape
    k = len(kernel2d)
    p = k // 2
    w = jnp.asarray(kernel2d, dtype=jnp.float32).reshape(1, 1, k, k)
    planes = x[:, :3].astype(jnp.float32).reshape(N * 3, 1, H, W)
    y = jax.lax.conv_general_dilated(
        planes, w, window_strides=(1, 1), padding=[(p, p), (p, p)],
        dimension_numbers=("NCHW", "OIHW", "NCHW"))
    return y.reshape(N, 3, H, W)


if __name__ == "__main__":
    key = jax.random.PRNGKey(0)
    N, C, H, W = 2, 4, 16, 16
    x = jax.random.normal(key, (N, C, H, W), dtype=jnp.float32)

    kernel2d = make_gaussian_kernel(k=3, sigma=1.0)

    out = gaussian_blur(x, kernel2d)
    out = jax.block_until_ready(out)

    ref = _reference_blur(x, kernel2d)
    assert out.shape == (N, 3, H, W)
    assert jnp.allclose(out, ref, atol=1e-5, rtol=1e-5)

    print("KERNEL_OK")
</pallas_src>

<mosaic_0001>
module attributes {stable_mosaic.version = 11 : i64} {
  func.func @_blur_kernel_body(%arg0: i32, %arg1: memref<6x16x16xf32, #tpu.memory_space<vmem>>, %arg2: memref<6x16x16xf32, #tpu.memory_space<vmem>>, %arg3: memref<6x16x18xf32, #tpu.memory_space<vmem>>, %arg4: memref<6x18x16xf32, #tpu.memory_space<vmem>>) attributes {dimension_semantics = [#tpu.dimension_semantics<parallel>], iteration_bounds = array<i64: 1>, scalar_prefetch = 0 : i64, scratch_operands = 2 : i64, tpu.core_type = #tpu.core_type<tc>, window_params = [{transform_indices = @transform_0, window_bounds = array<i64: 6, 16, 16>}, {transform_indices = @transform_1, window_bounds = array<i64: 6, 16, 16>}]} {
    %cst = arith.constant 0.000000e+00 : f32
    %0 = vector.broadcast %cst : f32 to vector<6x16x1xf32>
    %c0 = arith.constant 0 : index
    %c0_0 = arith.constant 0 : index
    %c0_1 = arith.constant 0 : index
    %1 = vector.load %arg3[%c0, %c0_0, %c0_1] : memref<6x16x18xf32, #tpu.memory_space<vmem>>, vector<6x16x1xf32>
    tpu.vector_store %arg3[%c0, %c0_0, %c0_1], %0 {strides = array<i32>} : memref<6x16x18xf32, #tpu.memory_space<vmem>>, vector<6x16x1xf32>,
    %c0_2 = arith.constant 0 : index
    %c0_3 = arith.constant 0 : index
    %c17 = arith.constant 17 : index
    %2 = vector.load %arg3[%c0_2, %c0_3, %c17] : memref<6x16x18xf32, #tpu.memory_space<vmem>>, vector<6x16x1xf32>
    tpu.vector_store %arg3[%c0_2, %c0_3, %c17], %0 {strides = array<i32>} : memref<6x16x18xf32, #tpu.memory_space<vmem>>, vector<6x16x1xf32>,
    %c0_4 = arith.constant 0 : index
    %c0_5 = arith.constant 0 : index
    %c0_6 = arith.constant 0 : index
    %3 = vector.load %arg1[%c0_4, %c0_5, %c0_6] : memref<6x16x16xf32, #tpu.memory_space<vmem>>, vector<6x16x16xf32>
    %c0_7 = arith.constant 0 : index
    %c0_8 = arith.constant 0 : index
    %c1 = arith.constant 1 : index
    %4 = vector.load %arg3[%c0_7, %c0_8, %c1] : memref<6x16x18xf32, #tpu.memory_space<vmem>>, vector<6x16x16xf32>
    tpu.vector_store %arg3[%c0_7, %c0_8, %c1], %3 {strides = array<i32>} : memref<6x16x18xf32, #tpu.memory_space<vmem>>, vector<6x16x16xf32>,
    %c0_9 = arith.constant 0 : index
    %c0_10 = arith.constant 0 : index
    %c0_11 = arith.constant 0 : index
    %5 = vector.load %arg3[%c0_9, %c0_10, %c0_11] : memref<6x16x18xf32, #tpu.memory_space<vmem>>, vector<6x16x16xf32>
    %cst_12 = arith.constant 0.274068624 : f32
    %6 = vector.broadcast %cst_12 : f32 to vector<6x16x16xf32>
    %7 = arith.mulf %6, %5 : vector<6x16x16xf32>
    %c0_13 = arith.constant 0 : index
    %c0_14 = arith.constant 0 : index
    %c1_15 = arith.constant 1 : index
    %8 = vector.load %arg3[%c0_13, %c0_14, %c1_15] : memref<6x16x18xf32, #tpu.memory_space<vmem>>, vector<6x16x16xf32>
    %cst_16 = arith.constant 0.451862752 : f32
    %9 = vector.broadcast %cst_16 : f32 to vector<6x16x16xf32>
    %10 = arith.mulf %9, %8 : vector<6x16x16xf32>
    %c0_17 = arith.constant 0 : index
    %c0_18 = arith.constant 0 : index
    %c2 = arith.constant 2 : index
    %11 = vector.load %arg3[%c0_17, %c0_18, %c2] : memref<6x16x18xf32, #tpu.memory_space<vmem>>, vector<6x16x16xf32>
    %cst_19 = arith.constant 0.274068624 : f32
    %12 = vector.broadcast %cst_19 : f32 to vector<6x16x16xf32>
    %13 = arith.mulf %12, %11 : vector<6x16x16xf32>
    %14 = arith.addf %7, %10 : vector<6x16x16xf32>
    %15 = arith.addf %14, %13 : vector<6x16x16xf32>
    %cst_20 = arith.constant 0.000000e+00 : f32
    %16 = vector.broadcast %cst_20 : f32 to vector<6x1x16xf32>
    %c0_21 = arith.constant 0 : index
    %c0_22 = arith.constant 0 : index
    %c0_23 = arith.constant 0 : index
    %17 = vector.load %arg4[%c0_21, %c0_22, %c0_23] : memref<6x18x16xf32, #tpu.memory_space<vmem>>, vector<6x1x16xf32>
    tpu.vector_store %arg4[%c0_21, %c0_22, %c0_23], %16 {strides = array<i32>} : memref<6x18x16xf32, #tpu.memory_space<vmem>>, vector<6x1x16xf32>,
    %c0_24 = arith.constant 0 : index
    %c17_25 = arith.constant 17 : index
    %c0_26 = arith.constant 0 : index
    %18 = vector.load %arg4[%c0_24, %c17_25, %c0_26] : memref<6x18x16xf32, #tpu.memory_space<vmem>>, vector<6x1x16xf32>
    tpu.vector_store %arg4[%c0_24, %c17_25, %c0_26], %16 {strides = array<i32>} : memref<6x18x16xf32, #tpu.memory_space<vmem>>, vector<6x1x16xf32>,
    %c0_27 = arith.constant 0 : index
    %c1_28 = arith.constant 1 : index
    %c0_29 = arith.constant 0 : index
    %19 = vector.load %arg4[%c0_27, %c1_28, %c0_29] : memref<6x18x16xf32, #tpu.memory_space<vmem>>, vector<6x16x16xf32>
    tpu.vector_store %arg4[%c0_27, %c1_28, %c0_29], %15 {strides = array<i32>} : memref<6x18x16xf32, #tpu.memory_space<vmem>>, vector<6x16x16xf32>,
    %c0_30 = arith.constant 0 : index
    %c0_31 = arith.constant 0 : index
    %c0_32 = arith.constant 0 : index
    %20 = vector.load %arg4[%c0_30, %c0_31, %c0_32] : memref<6x18x16xf32, #tpu.memory_space<vmem>>, vector<6x16x16xf32>
    %cst_33 = arith.constant 0.274068624 : f32
    %21 = vector.broadcast %cst_33 : f32 to vector<6x16x16xf32>
    %22 = arith.mulf %21, %20 : vector<6x16x16xf32>
    %c0_34 = arith.constant 0 : index
    %c1_35 = arith.constant 1 : index
    %c0_36 = arith.constant 0 : index
    %23 = vector.load %arg4[%c0_34, %c1_35, %c0_36] : memref<6x18x16xf32, #tpu.memory_space<vmem>>, vector<6x16x16xf32>
    %cst_37 = arith.constant 0.451862752 : f32
    %24 = vector.broadcast %cst_37 : f32 to vector<6x16x16xf32>
    %25 = arith.mulf %24, %23 : vector<6x16x16xf32>
    %c0_38 = arith.constant 0 : index
    %c2_39 = arith.constant 2 : index
    %c0_40 = arith.constant 0 : index
    %26 = vector.load %arg4[%c0_38, %c2_39, %c0_40] : memref<6x18x16xf32, #tpu.memory_space<vmem>>, vector<6x16x16xf32>
    %cst_41 = arith.constant 0.274068624 : f32
    %27 = vector.broadcast %cst_41 : f32 to vector<6x16x16xf32>
    %28 = arith.mulf %27, %26 : vector<6x16x16xf32>
    %29 = arith.addf %22, %25 : vector<6x16x16xf32>
    %30 = arith.addf %29, %28 : vector<6x16x16xf32>
    %c0_42 = arith.constant 0 : index
    %c0_43 = arith.constant 0 : index
    %c0_44 = arith.constant 0 : index
    %31 = vector.load %arg2[%c0_42, %c0_43, %c0_44] : memref<6x16x16xf32, #tpu.memory_space<vmem>>, vector<6x16x16xf32>
    tpu.vector_store %arg2[%c0_42, %c0_43, %c0_44], %30 {strides = array<i32>} : memref<6x16x16xf32, #tpu.memory_space<vmem>>, vector<6x16x16xf32>,
    return
  }
  func.func @transform_0(%arg0: i32) -> (i32, i32, i32) {
    %c0_i32 = arith.constant 0 : i32
    %c0_i32_0 = arith.constant 0 : i32
    %c0_i32_1 = arith.constant 0 : i32
    return %arg0, %c0_i32, %c0_i32_0 : i32, i32, i32
  }
  func.func @transform_1(%arg0: i32) -> (i32, i32, i32) {
    %c0_i32 = arith.constant 0 : i32
    %c0_i32_0 = arith.constant 0 : i32
    %c0_i32_1 = arith.constant 0 : i32
    return %arg0, %c0_i32, %c0_i32_0 : i32, i32, i32
  }
}

</mosaic_0001>

<bundles_post_ra>
// kernel: tpu_custom_call.1
= control target key start
LH: loop header
LB: loop body
LE: loop exit
PB: predicated region body
PF: predicated region fallthrough
CT: control target
= control target key end

     0   :  { %6 = vsyncpa [#allocation5], 0  ;;  %s652_s0 = inlined_call_operand.hbm [shape: f32[6,16,16], index: 0, kind: input, shape index: {}]   ;;  %s653_s1 = inlined_call_operand.hbm [shape: f32[6,16,16], index: 1, kind: output, shape index: {}]  }
   0x1   :  { %7 = vsyncpa [#allocation6], 0  ;;  %s485_s6 = smov [#allocation4]   ;;  %s437_s10 = scalar_lea.hbm %s652_s0, 1536 }
   0x2   :  { %s13_s7 = sshll.u32 %s485_s6, 4  ;;  %p438_p0 = scmp.ne.s32.totalorder %s652_s0, %s437_s10  ;;  %s14_s7 = int_to_ptr.vmem [resolvable:$true] %s13_s7 }
   0x3   :  { %p441_p1 = scmp.lt.u32.totalorder %s437_s10, %s652_s0 }
   0x5   :  { %p443_p2 = pnand %p441_p1, %p438_p0 }
   0x7   :  { %446 = shalt.err (!%p443_p2)
}
   0x8   :  { %s447_s15 = scalar_lea.vmem %s14_s7, 1536  ;;  %p452_p4 = scmp.lt.s32.totalorder %s14_s7, %s14_s7 }
   0x9   :  { %p448_p3 = scmp.ne.s32.totalorder %s14_s7, %s447_s15  ;;  %p453_p5 = scmp.lt.s32.totalorder %s447_s15, %s447_s15 }
   0xb   :  { %p454_p6 = por %p453_p5, %p452_p4 }
   0xd   :  { %p455_p7 = pnand %p454_p6, %p448_p3 }
   0xf   :  { %458 = shalt.err (!%p455_p7)
}
  0x10   :  { %s486_s16 = smov 128   ;;  %s487_s17 = smov 8  }
  0x11   :  { %19 = dma.hbm_to_vmem [thread:$0]  %s652_s0, 1536, %s14_s7, [#allocation5], %s486_s16, %s486_s16, %s487_s17  }
  0x12   :  { %481 = dma.done.wait [#allocation5], 1536  }
  0x13   :  { %482 = vsyncadd [#allocation5], 4294965760  ;;  %vm23_vm0 = vcmask 7168   ;;  %vm36_vm1 = vcmask 146568   ;;  %v488_v0 = vmov 0.0   ;;  %v49_v1 = vld [vmem:[#allocation4] sm:$0xff] }
  0x14   :  { %24 = vst.msk [vmem:[#allocation2] sm:$0xff] %vm23_vm0, %v488_v0  ;;  %25 = vst.msk [vmem:[#allocation2 + $0x8] sm:$0xff] %vm23_vm0, %v488_v0  ;;  %v51_v2 = vld [vmem:[#allocation4 + $0x10] sm:$0xff]  ;;  %s489_s0 = smov 1   ;;  %v50_v3 = vld [vmem:[#allocation4 + $0x8] sm:$0xff]  ;;  %vm109_vm2 = vcmask 138248  }
  0x15   :  { %26 = vst.msk [vmem:[#allocation2 + $0x10] sm:$0xff] %vm23_vm0, %v488_v0  ;;  %27 = vst.msk [vmem:[#allocation2 + $0x18] sm:$0xff] %vm23_vm0, %v488_v0  ;;  %73 = vrot.lane.b32.xlu0 %v49_v1, %s489_s0  ;;  %77 = vrot.lane.b32.xlu1 %v51_v2, %s489_s0  ;;  %v52_v4 = vld [vmem:[#allocation4 + $0x18] sm:$0xff]  ;;  %v53_v5 = vld [vmem:[#allocation4 + $0x20] sm:$0xff]  ;;  %s490_s20 = smov 127   ;;  %vm278_vm3 = vcmask 122880  }
  0x16   :  { %28 = vst.msk [vmem:[#allocation2 + $0x20] sm:$0xff] %vm23_vm0, %v488_v0  ;;  %29 = vst.msk [vmem:[#allocation2 + $0x28] sm:$0xff] %vm23_vm0, %v488_v0  ;;  %v54_v6 = vld [vmem:[#allocation4 + $0x28] sm:$0xff]  ;;  %v55_v7 = vld [vmem:[#allocation4 + $0x30] sm:$0xff]  ;;  %s491_s21 = smov 126   ;;  %vm291_vm4 = vcmask 130048  }
  0x17   :  { %30 = vst.msk [vmem:[#allocation2 + $0x30] sm:$0xff] %vm23_vm0, %v488_v0  ;;  %31 = vst.msk [vmem:[#allocation2 + $0x38] sm:$0xff] %vm23_vm0, %v488_v0  ;;  %v56_v8 = vld [vmem:[#allocation4 + $0x38] sm:$0xff]  ;;  %v57_v9 = vld [vmem:[#allocation4 + $0x40] sm:$0xff]  ;;  %s492_s22 = smov [#allocation7]  }
  0x18   :  { %32 = vst.msk [vmem:[#allocation2 + $0x40] sm:$0xff] %vm23_vm0, %v488_v0  ;;  %33 = vst.msk [vmem:[#allocation2 + $0x48] sm:$0xff] %vm23_vm0, %v488_v0  ;;  %v58_v10 = vld [vmem:[#allocation4 + $0x48] sm:$0xff]  ;;  %v59_v11 = vld [vmem:[#allocation4 + $0x50] sm:$0xff]  ;;  %s417_s23 = sshll.u32 %s492_s22, 4  ;;  %s418_s23 = int_to_ptr.vmem [resolvable:$true] %s417_s23 }
  0x19   :  { %34 = vst.msk [vmem:[#allocation2 + $0x50] sm:$0xff] %vm23_vm0, %v488_v0  ;;  %35 = vst.msk [vmem:[#allocation2 + $0x58] sm:$0xff] %vm23_vm0, %v488_v0  ;;  %75 = vrot.lane.b32.xlu0 %v50_v3, %s489_s0  ;;  %79 = vrot.lane.b32.xlu1 %v52_v4, %s489_s0  ;;  %v60_v12 = vld [vmem:[#allocation4 + $0x58] sm:$0xff]  ;;  %s459_s24 = scalar_lea.vmem %s418_s23, 1536  ;;  %p464_p9 = scmp.lt.s32.totalorder %s418_s23, %s418_s23 }
  0x1a   :  { %37 = vst.msk [vmem:[#allocation2] sm:$0xff] %vm36_vm1, %v488_v0  ;;  %39 = vst.msk [vmem:[#allocation2 + $0x10] sm:$0xff] %vm36_vm1, %v488_v0  ;;  %p460_p8 = scmp.ne.s32.totalorder %s418_s23, %s459_s24  ;;  %p465_p10 = scmp.lt.s32.totalorder %s459_s24, %s459_s24 }
  0x1b   :  { %38 = vst.msk [vmem:[#allocation2 + $0x8] sm:$0xff] %vm36_vm1, %v488_v0  ;;  %40 = vst.msk [vmem:[#allocation2 + $0x18] sm:$0xff] %vm36_vm1, %v488_v0 }
  0x1c   :  { %41 = vst.msk [vmem:[#allocation2 + $0x20] sm:$0xff] %vm36_vm1, %v488_v0  ;;  %42 = vst.msk [vmem:[#allocation2 + $0x28] sm:$0xff] %vm36_vm1, %v488_v0  ;;  %p466_p11 = por %p465_p10, %p464_p9 }
  0x1d   :  { %43 = vst.msk [vmem:[#allocation2 + $0x30] sm:$0xff] %vm36_vm1, %v488_v0  ;;  %44 = vst.msk [vmem:[#allocation2 + $0x38] sm:$0xff] %vm36_vm1, %v488_v0  ;;  %81 = vrot.lane.b32.xlu0 %v53_v5, %s489_s0  ;;  %83 = vrot.lane.b32.xlu1 %v54_v6, %s489_s0 }
  0x1e   :  { %45 = vst.msk [vmem:[#allocation2 + $0x40] sm:$0xff] %vm36_vm1, %v488_v0  ;;  %46 = vst.msk [vmem:[#allocation2 + $0x48] sm:$0xff] %vm36_vm1, %v488_v0  ;;  %p467_p12 = pnand %p466_p11, %p460_p8 }
  0x1f   :  { %47 = vst.msk [vmem:[#allocation2 + $0x50] sm:$0xff] %vm36_vm1, %v488_v0  ;;  %48 = vst.msk [vmem:[#allocation2 + $0x58] sm:$0xff] %vm36_vm1, %v488_v0 }
  0x20   :  { %279 = vst.msk [vmem:[#allocation3] sm:$0x1] %vm278_vm3, %v488_v0  ;;  %280 = vst.msk [vmem:[#allocation3 + $0x18] sm:$0x1] %vm278_vm3, %v488_v0 }
  0x21   :  { %85 = vrot.lane.b32.xlu0 %v55_v7, %s489_s0  ;;  %87 = vrot.lane.b32.xlu1 %v56_v8, %s489_s0  ;;  %281 = vst.msk [vmem:[#allocation3 + $0x30] sm:$0x1] %vm278_vm3, %v488_v0  ;;  %282 = vst.msk [vmem:[#allocation3 + $0x48] sm:$0x1] %vm278_vm3, %v488_v0 }
  0x22   :  { %283 = vst.msk [vmem:[#allocation3 + $0x60] sm:$0x1] %vm278_vm3, %v488_v0  ;;  %284 = vst.msk [vmem:[#allocation3 + $0x78] sm:$0x1] %vm278_vm3, %v488_v0 }
  0x23   :  { %285 = vst.msk [vmem:[#allocation3 + $0x11] sm:$0x1] %vm278_vm3, %v488_v0  ;;  %286 = vst.msk [vmem:[#allocation3 + $0x29] sm:$0x1] %vm278_vm3, %v488_v0 }
  0x24   :  { %287 = vst.msk [vmem:[#allocation3 + $0x41] sm:$0x1] %vm278_vm3, %v488_v0  ;;  %288 = vst.msk [vmem:[#allocation3 + $0x59] sm:$0x1] %vm278_vm3, %v488_v0 }
  0x25   :  { %89 = vrot.lane.b32.xlu0 %v57_v9, %s489_s0  ;;  %91 = vrot.lane.b32.xlu1 %v58_v10, %s489_s0  ;;  %289 = vst.msk [vmem:[#allocation3 + $0x71] sm:$0x1] %vm278_vm3, %v488_v0  ;;  %290 = vst.msk [vmem:[#allocation3 + $0x89] sm:$0x1] %vm278_vm3, %v488_v0 }
  0x29   :  { %93 = vrot.lane.b32.xlu0 %v59_v11, %s489_s0  ;;  %95 = vrot.lane.b32.xlu1 %v60_v12, %s489_s0 }
  0x87   :  { %v74_v13 = vpop.permute.xlu0 %73  ;;  %v78_v14 = vpop.permute.xlu1 %77 }
  0x88   :  { %110 = vst.msk [vmem:[#allocation2] sm:$0xff] %vm109_vm2, %v74_v13  ;;  %112 = vst.msk [vmem:[#allocation2 + $0x10] sm:$0xff] %vm109_vm2, %v78_v14 }
  0x8b   :  { %v76_v15 = vpop.permute.xlu0 %75  ;;  %v80_v16 = vpop.permute.xlu1 %79 }
  0x8c   :  { %111 = vst.msk [vmem:[#allocation2 + $0x8] sm:$0xff] %vm109_vm2, %v76_v15  ;;  %113 = vst.msk [vmem:[#allocation2 + $0x18] sm:$0xff] %vm109_vm2, %v80_v16 }
  0x8f   :  { %v82_v17 = vpop.permute.xlu0 %81  ;;  %v558_v18 = vld [vmem:[#allocation2] sm:$0xff]  ;;  %v84_v19 = vpop.permute.xlu1 %83  ;;  %v560_v20 = vld [vmem:[#allocation2 + $0x10] sm:$0xff] }
  0x90   :  { %114 = vst.msk [vmem:[#allocation2 + $0x20] sm:$0xff] %vm109_vm2, %v82_v17  ;;  %v146_v21 = vmul.f32 0.45186275, %v558_v18  ;;  %115 = vst.msk [vmem:[#allocation2 + $0x28] sm:$0xff] %vm109_vm2, %v84_v19  ;;  %v148_v22 = vmul.f32 0.45186275, %v560_v20 }
  0x91   :  { %v134_v49 = vmul.f32 0.27406862, %v558_v18  ;;  %v136_v51 = vmul.f32 0.27406862, %v560_v20 }
  0x92   :  { %170 = vrot.lane.b32.xlu0 %v146_v21, %s490_s20 }
  0x93   :  { %v86_v23 = vpop.permute.xlu0 %85  ;;  %v123_v24 = vld [vmem:[#allocation2 + $0x8] sm:$0xff]  ;;  %v88_v25 = vpop.permute.xlu1 %87  ;;  %v125_v26 = vld [vmem:[#allocation2 + $0x18] sm:$0xff] }
  0x94   :  { %116 = vst.msk [vmem:[#allocation2 + $0x30] sm:$0xff] %vm109_vm2, %v86_v23  ;;  %v147_v27 = vmul.f32 0.45186275, %v123_v24  ;;  %117 = vst.msk [vmem:[#allocation2 + $0x38] sm:$0xff] %vm109_vm2, %v88_v25  ;;  %v149_v28 = vmul.f32 0.45186275, %v125_v26 }
  0x95   :  { %v135_v50 = vmul.f32 0.27406862, %v123_v24  ;;  %v137_v52 = vmul.f32 0.27406862, %v125_v26 }
  0x96   :  { %172 = vrot.lane.b32.xlu1 %v147_v27, %s490_s20  ;;  %174 = vrot.lane.b32.xlu0 %v148_v22, %s490_s20 }
  0x97   :  { %v90_v29 = vpop.permute.xlu0 %89  ;;  %v126_v30 = vld [vmem:[#allocation2 + $0x20] sm:$0xff]  ;;  %v92_v31 = vpop.permute.xlu1 %91  ;;  %v127_v32 = vld [vmem:[#allocation2 + $0x28] sm:$0xff] }
  0x98   :  { %118 = vst.msk [vmem:[#allocation2 + $0x40] sm:$0xff] %vm109_vm2, %v90_v29  ;;  %v150_v33 = vmul.f32 0.45186275, %v126_v30  ;;  %119 = vst.msk [vmem:[#allocation2 + $0x48] sm:$0xff] %vm109_vm2, %v92_v31  ;;  %v151_v34 = vmul.f32 0.45186275, %v127_v32 }
  0x99   :  { %v138_v53 = vmul.f32 0.27406862, %v126_v30  ;;  %v139_v54 = vmul.f32 0.27406862, %v127_v32 }
  0x9a   :  { %176 = vrot.lane.b32.xlu1 %v149_v28, %s490_s20  ;;  %178 = vrot.lane.b32.xlu0 %v150_v33, %s490_s20 }
  0x9b   :  { %v94_v35 = vpop.permute.xlu0 %93  ;;  %v128_v36 = vld [vmem:[#allocation2 + $0x30] sm:$0xff]  ;;  %v96_v37 = vpop.permute.xlu1 %95  ;;  %v129_v38 = vld [vmem:[#allocation2 + $0x38] sm:$0xff] }
  0x9c   :  { %120 = vst.msk [vmem:[#allocation2 + $0x50] sm:$0xff] %vm109_vm2, %v94_v35  ;;  %v152_v39 = vmul.f32 0.45186275, %v128_v36  ;;  %121 = vst.msk [vmem:[#allocation2 + $0x58] sm:$0xff] %vm109_vm2, %v96_v37  ;;  %v153_v40 = vmul.f32 0.45186275, %v129_v38 }
  0x9d   :  { %v140_v55 = vmul.f32 0.27406862, %v128_v36  ;;  %v141_v56 = vmul.f32 0.27406862, %v129_v38 }
  0x9e   :  { %180 = vrot.lane.b32.xlu1 %v151_v34, %s490_s20  ;;  %182 = vrot.lane.b32.xlu0 %v152_v39, %s490_s20 }
  0x9f   :  { %v130_v41 = vld [vmem:[#allocation2 + $0x40] sm:$0xff]  ;;  %v131_v42 = vld [vmem:[#allocation2 + $0x48] sm:$0xff] }
  0xa0   :  { %v154_v43 = vmul.f32 0.45186275, %v130_v41  ;;  %v155_v44 = vmul.f32 0.45186275, %v131_v42  ;;  %v142_v57 = vmul.f32 0.27406862, %v130_v41 }
  0xa1   :  { %v598_v58 = vmul.f32 0.27406862, %v131_v42 }
  0xa2   :  { %184 = vrot.lane.b32.xlu1 %v153_v40, %s490_s20  ;;  %186 = vrot.lane.b32.xlu0 %v154_v43, %s490_s20 }
  0xa3   :  { %v132_v45 = vld [vmem:[#allocation2 + $0x50] sm:$0xff]  ;;  %v133_v46 = vld [vmem:[#allocation2 + $0x58] sm:$0xff] }
  0xa4   :  { %v156_v47 = vmul.f32 0.45186275, %v132_v45  ;;  %v157_v48 = vmul.f32 0.45186275, %v133_v46  ;;  %v600_v59 = vmul.f32 0.27406862, %v132_v45 }
  0xa5   :  { %v604_v60 = vmul.f32 0.27406862, %v133_v46 }
  0xa6   :  { %188 = vrot.lane.b32.xlu1 %v155_v44, %s490_s20  ;;  %190 = vrot.lane.b32.xlu0 %v156_v47, %s490_s20 }
  0xaa   :  { %192 = vrot.lane.b32.xlu1 %v157_v48, %s490_s20  ;;  %230 = vrot.lane.b32.xlu0 %v134_v49, %s491_s21 }
  0xae   :  { %232 = vrot.lane.b32.xlu1 %v135_v50, %s491_s21  ;;  %234 = vrot.lane.b32.xlu0 %v136_v51, %s491_s21 }
  0xb2   :  { %236 = vrot.lane.b32.xlu1 %v137_v52, %s491_s21  ;;  %238 = vrot.lane.b32.xlu0 %v138_v53, %s491_s21 }
  0xb6   :  { %240 = vrot.lane.b32.xlu1 %v139_v54, %s491_s21  ;;  %242 = vrot.lane.b32.xlu0 %v140_v55, %s491_s21 }
  0xba   :  { %244 = vrot.lane.b32.xlu1 %v141_v56, %s491_s21  ;;  %246 = vrot.lane.b32.xlu0 %v142_v57, %s491_s21 }
  0xbe   :  { %248 = vrot.lane.b32.xlu1 %v598_v58, %s491_s21  ;;  %250 = vrot.lane.b32.xlu0 %v600_v59, %s491_s21 }
  0xc2   :  { %252 = vrot.lane.b32.xlu1 %v604_v60, %s491_s21 }
 0x104   :  { %v171_v61 = vpop.permute.xlu0 %170 }
 0x105   :  { %v206_v8 = vadd.f32 %v171_v61, %v134_v49 }
 0x108   :  { %v173_v62 = vpop.permute.xlu1 %172  ;;  %v175_v63 = vpop.permute.xlu0 %174 }
 0x109   :  { %v207_v12 = vadd.f32 %v173_v62, %v135_v50  ;;  %v208_v13 = vadd.f32 %v175_v63, %v136_v51 }
 0x10c   :  { %v177_v0 = vpop.permute.xlu1 %176  ;;  %v179_v1 = vpop.permute.xlu0 %178 }
 0x10d   :  { %v209_v18 = vadd.f32 %v177_v0, %v137_v52  ;;  %v210_v19 = vadd.f32 %v179_v1, %v138_v53 }
 0x110   :  { %v181_v2 = vpop.permute.xlu1 %180  ;;  %v183_v3 = vpop.permute.xlu0 %182 }
 0x111   :  { %v211_v26 = vadd.f32 %v181_v2, %v139_v54  ;;  %v212_v27 = vadd.f32 %v183_v3, %v140_v55 }
 0x114   :  { %v185_v4 = vpop.permute.xlu1 %184  ;;  %v187_v5 = vpop.permute.xlu0 %186 }
 0x115   :  { %v213_v37 = vadd.f32 %v185_v4, %v141_v56  ;;  %v214_v38 = vadd.f32 %v187_v5, %v142_v57 }
 0x118   :  { %v189_v6 = vpop.permute.xlu1 %188  ;;  %v191_v7 = vpop.permute.xlu0 %190 }
 0x119   :  { %v215_v53 = vadd.f32 %v189_v6, %v598_v58  ;;  %v216_v62 = vadd.f32 %v191_v7, %v600_v59 }
 0x11c   :  { %v607_v9 = vpop.permute.xlu1 %192  ;;  %v231_v10 = vpop.permute.xlu0 %230 }
 0x11d   :  { %v266_v11 = vadd.f32 %v231_v10, %v206_v8 }
 0x11f   :  { %292 = vst.msk [vmem:[#allocation3 + $0x1] sm:$0xff] %vm291_vm4, %v266_v11 }
 0x120   :  { %v233_v14 = vpop.permute.xlu1 %232  ;;  %v235_v15 = vpop.permute.xlu0 %234 }
 0x121   :  { %v267_v16 = vadd.f32 %v233_v14, %v207_v12  ;;  %v268_v17 = vadd.f32 %v235_v15, %v208_v13 }
 0x123   :  { %293 = vst.msk [vmem:[#allocation3 + $0x9] sm:$0xff] %vm291_vm4, %v267_v16  ;;  %294 = vst.msk [vmem:[#allocation3 + $0x19] sm:$0xff] %vm291_vm4, %v268_v17 }
 0x124   :  { %v237_v20 = vpop.permute.xlu1 %236  ;;  %v239_v21 = vpop.permute.xlu0 %238 }
 0x125   :  { %v269_v22 = vadd.f32 %v237_v20, %v209_v18  ;;  %v270_v23 = vadd.f32 %v239_v21, %v210_v19  ;;  %v217_v18 = vadd.f32 %v607_v9, %v604_v60 }
 0x126   :  { %v304_v24 = vld [vmem:[#allocation3] sm:$0xff] }
 0x127   :  { %v328_v25 = vld [vmem:[#allocation3 + $0x1] sm:$0xff]  ;;  %295 = vst.msk [vmem:[#allocation3 + $0x21] sm:$0xff] %vm291_vm4, %v269_v22  ;;  %296 = vst.msk [vmem:[#allocation3 + $0x31] sm:$0xff] %vm291_vm4, %v270_v23  ;;  %v316_v28 = vmul.f32 0.27406862, %v304_v24 }
 0x128   :  { %v340_v29 = vmul.f32 0.45186275, %v328_v25  ;;  %v241_v30 = vpop.permute.xlu1 %240  ;;  %v243_v31 = vpop.permute.xlu0 %242 }
 0x129   :  { %v271_v32 = vadd.f32 %v241_v30, %v211_v26  ;;  %v272_v33 = vadd.f32 %v243_v31, %v212_v27 }
 0x12a   :  { %v305_v34 = vld [vmem:[#allocation3 + $0x8] sm:$0xff]  ;;  %v306_v42 = vld [vmem:[#allocation3 + $0x18] sm:$0xff]  ;;  %v376_v43 = vadd.f32 %v340_v29, %v316_v28 }
 0x12b   :  { %v329_v35 = vld [vmem:[#allocation3 + $0x9] sm:$0xff]  ;;  %v317_v39 = vmul.f32 0.27406862, %v305_v34  ;;  %297 = vst.msk [vmem:[#allocation3 + $0x39] sm:$0xff] %vm291_vm4, %v271_v32  ;;  %298 = vst.msk [vmem:[#allocation3 + $0x49] sm:$0xff] %vm291_vm4, %v272_v33  ;;  %v330_v50 = vld [vmem:[#allocation3 + $0x19] sm:$0xff] }
 0x12c   :  { %v352_v36 = vld [vmem:[#allocation3 + $0x2] sm:$0xff]  ;;  %v341_v40 = vmul.f32 0.45186275, %v329_v35  ;;  %v353_v41 = vld [vmem:[#allocation3 + $0xa] sm:$0xff]  ;;  %v318_v45 = vmul.f32 0.27406862, %v306_v42  ;;  %v245_v46 = vpop.permute.xlu1 %244  ;;  %v247_v47 = vpop.permute.xlu0 %246 }
 0x12d   :  { %v364_v44 = vmul.f32 0.27406862, %v352_v36  ;;  %v365_v48 = vmul.f32 0.27406862, %v353_v41  ;;  %v273_v51 = vadd.f32 %v245_v46, %v213_v37  ;;  %v274_v52 = vadd.f32 %v247_v47, %v214_v38 }
 0x12e   :  { %v377_v49 = vadd.f32 %v341_v40, %v317_v39  ;;  %v342_v55 = vmul.f32 0.45186275, %v330_v50  ;;  %v307_v56 = vld [vmem:[#allocation3 + $0x20] sm:$0xff]  ;;  %v308_v3 = vld [vmem:[#allocation3 + $0x30] sm:$0xff] }
 0x12f   :  { %v388_v54 = vadd.f32 %v376_v43, %v364_v44  ;;  %v331_v57 = vld [vmem:[#allocation3 + $0x21] sm:$0xff]  ;;  %v319_v0 = vmul.f32 0.27406862, %v307_v56  ;;  %299 = vst.msk [vmem:[#allocation3 + $0x51] sm:$0xff] %vm291_vm4, %v273_v51  ;;  %300 = vst.msk [vmem:[#allocation3 + $0x61] sm:$0xff] %vm291_vm4, %v274_v52  ;;  %v332_v7 = vld [vmem:[#allocation3 + $0x31] sm:$0xff] }
 0x130   :  { %v354_v61 = vld [vmem:[#allocation3 + $0x1a] sm:$0xff]  ;;  %v389_v63 = vadd.f32 %v377_v49, %v365_v48  ;;  %v343_v1 = vmul.f32 0.45186275, %v331_v57  ;;  %v355_v2 = vld [vmem:[#allocation3 + $0x22] sm:$0xff]  ;;  %v378_v4 = vadd.f32 %v342_v55, %v318_v45  ;;  %v320_v5 = vmul.f32 0.27406862, %v308_v3  ;;  %v249_v6 = vpop.permute.xlu1 %248  ;;  %v251_v8 = vpop.permute.xlu0 %250 }
 0x131   :  { %400 = vst.msk [vmem:[#allocation7] sm:$0xff] %vm291_vm4, %v388_v54  ;;  %v366_v58 = vmul.f32 0.27406862, %v354_v61  ;;  %v367_v10 = vmul.f32 0.27406862, %v355_v2  ;;  %v275_v11 = vadd.f32 %v249_v6, %v215_v53  ;;  %v276_v12 = vadd.f32 %v251_v8, %v216_v62 }
 0x132   :  { %401 = vst.msk [vmem:[#allocation7 + $0x8] sm:$0xff] %vm291_vm4, %v389_v63  ;;  %v379_v59 = vadd.f32 %v343_v1, %v319_v0  ;;  %v344_v14 = vmul.f32 0.45186275, %v332_v7  ;;  %v309_v15 = vld [vmem:[#allocation3 + $0x38] sm:$0xff]  ;;  %v310_v23 = vld [vmem:[#allocation3 + $0x48] sm:$0xff] }
 0x133   :  { %v390_v13 = vadd.f32 %v378_v4, %v366_v58  ;;  %v333_v16 = vld [vmem:[#allocation3 + $0x39] sm:$0xff]  ;;  %v321_v20 = vmul.f32 0.27406862, %v309_v15  ;;  %301 = vst.msk [vmem:[#allocation3 + $0x69] sm:$0xff] %vm291_vm4, %v275_v11  ;;  %302 = vst.msk [vmem:[#allocation3 + $0x79] sm:$0xff] %vm291_vm4, %v276_v12  ;;  %v334_v60 = vld [vmem:[#allocation3 + $0x49] sm:$0xff] }
 0x134   :  { %v356_v17 = vld [vmem:[#allocation3 + $0x32] sm:$0xff]  ;;  %v391_v19 = vadd.f32 %v379_v59, %v367_v10  ;;  %v345_v21 = vmul.f32 0.45186275, %v333_v16  ;;  %v357_v22 = vld [vmem:[#allocation3 + $0x3a] sm:$0xff]  ;;  %v380_v24 = vadd.f32 %v344_v14, %v320_v5  ;;  %v322_v26 = vmul.f32 0.27406862, %v310_v23  ;;  %v253_v27 = vpop.permute.xlu1 %252 }
 0x135   :  { %402 = vst.msk [vmem:[#allocation7 + $0x10] sm:$0xff] %vm291_vm4, %v390_v13  ;;  %v368_v25 = vmul.f32 0.27406862, %v356_v17  ;;  %v369_v28 = vmul.f32 0.27406862, %v357_v22  ;;  %v277_v9 = vadd.f32 %v253_v27, %v217_v18 }
 0x136   :  { %403 = vst.msk [vmem:[#allocation7 + $0x18] sm:$0xff] %vm291_vm4, %v391_v19  ;;  %v381_v29 = vadd.f32 %v345_v21, %v321_v20  ;;  %v346_v31 = vmul.f32 0.45186275, %v334_v60  ;;  %v311_v32 = vld [vmem:[#allocation3 + $0x50] sm:$0xff]  ;;  %v312_v39 = vld [vmem:[#allocation3 + $0x60] sm:$0xff] }
 0x137   :  { %v392_v30 = vadd.f32 %v380_v24, %v368_v25  ;;  %v335_v33 = vld [vmem:[#allocation3 + $0x51] sm:$0xff]  ;;  %v323_v36 = vmul.f32 0.27406862, %v311_v32  ;;  %303 = vst.msk [vmem:[#allocation3 + $0x81] sm:$0xff] %vm291_vm4, %v277_v9  ;;  %v324_v42 = vmul.f32 0.27406862, %v312_v39 }
 0x138   :  { %v358_v34 = vld [vmem:[#allocation3 + $0x4a] sm:$0xff]  ;;  %v393_v35 = vadd.f32 %v381_v29, %v369_v28  ;;  %v347_v37 = vmul.f32 0.45186275, %v335_v33  ;;  %v359_v38 = vld [vmem:[#allocation3 + $0x52] sm:$0xff]  ;;  %v382_v40 = vadd.f32 %v346_v31, %v322_v26  ;;  %v336_v45 = vld [vmem:[#allocation3 + $0x61] sm:$0xff] }
 0x139   :  { %404 = vst.msk [vmem:[#allocation7 + $0x20] sm:$0xff] %vm291_vm4, %v392_v30  ;;  %v370_v41 = vmul.f32 0.27406862, %v358_v34  ;;  %v371_v43 = vmul.f32 0.27406862, %v359_v38 }
 0x13a   :  { %405 = vst.msk [vmem:[#allocation7 + $0x28] sm:$0xff] %vm291_vm4, %v393_v35  ;;  %v383_v44 = vadd.f32 %v347_v37, %v323_v36  ;;  %v348_v47 = vmul.f32 0.45186275, %v336_v45  ;;  %v313_v48 = vld [vmem:[#allocation3 + $0x68] sm:$0xff]  ;;  %v314_v55 = vld [vmem:[#allocation3 + $0x78] sm:$0xff] }
 0x13b   :  { %v394_v46 = vadd.f32 %v382_v40, %v370_v41  ;;  %v337_v49 = vld [vmem:[#allocation3 + $0x69] sm:$0xff]  ;;  %v325_v52 = vmul.f32 0.27406862, %v313_v48  ;;  %v326_v61 = vmul.f32 0.27406862, %v314_v55  ;;  %v338_v0 = vld [vmem:[#allocation3 + $0x79] sm:$0xff] }
 0x13c   :  { %v360_v50 = vld [vmem:[#allocation3 + $0x62] sm:$0xff]  ;;  %v395_v51 = vadd.f32 %v383_v44, %v371_v43  ;;  %v349_v53 = vmul.f32 0.45186275, %v337_v49  ;;  %v361_v54 = vld [vmem:[#allocation3 + $0x6a] sm:$0xff]  ;;  %v384_v56 = vadd.f32 %v348_v47, %v324_v42  ;;  %v350_v2 = vmul.f32 0.45186275, %v338_v0 }
 0x13d   :  { %406 = vst.msk [vmem:[#allocation7 + $0x30] sm:$0xff] %vm291_vm4, %v394_v46  ;;  %v372_v57 = vmul.f32 0.27406862, %v360_v50  ;;  %v373_v62 = vmul.f32 0.27406862, %v361_v54 }
 0x13e   :  { %407 = vst.msk [vmem:[#allocation7 + $0x38] sm:$0xff] %vm291_vm4, %v395_v51  ;;  %v385_v63 = vadd.f32 %v349_v53, %v325_v52  ;;  %v315_v3 = vld [vmem:[#allocation3 + $0x80] sm:$0xff]  ;;  %v386_v59 = vadd.f32 %v350_v2, %v326_v61 }
 0x13f   :  { %v396_v1 = vadd.f32 %v384_v56, %v372_v57  ;;  %v339_v4 = vld [vmem:[#allocation3 + $0x81] sm:$0xff]  ;;  %v327_v6 = vmul.f32 0.27406862, %v315_v3 }
 0x140   :  { %v362_v58 = vld [vmem:[#allocation3 + $0x7a] sm:$0xff]  ;;  %v397_v5 = vadd.f32 %v385_v63, %v373_v62  ;;  %v351_v8 = vmul.f32 0.45186275, %v339_v4  ;;  %v363_v10 = vld [vmem:[#allocation3 + $0x82] sm:$0xff] }
 0x141   :  { %408 = vst.msk [vmem:[#allocation7 + $0x40] sm:$0xff] %vm291_vm4, %v396_v1  ;;  %v374_v7 = vmul.f32 0.27406862, %v362_v58  ;;  %v375_v11 = vmul.f32 0.27406862, %v363_v10 }
 0x142   :  { %409 = vst.msk [vmem:[#allocation7 + $0x48] sm:$0xff] %vm291_vm4, %v397_v5  ;;  %v387_v12 = vadd.f32 %v351_v8, %v327_v6 }
 0x143   :  { %v398_v13 = vadd.f32 %v386_v59, %v374_v7 }
 0x144   :  { %v399_v14 = vadd.f32 %v387_v12, %v375_v11 }
 0x145   :  { %410 = vst.msk [vmem:[#allocation7 + $0x50] sm:$0xff] %vm291_vm4, %v398_v13 }
 0x146   :  { %411 = vst.msk [vmem:[#allocation7 + $0x58] sm:$0xff] %vm291_vm4, %v399_v14 }
 0x147   :  { %470 = shalt.err (!%p467_p12)
}
 0x148   :  { %s471_s27 = scalar_lea.hbm %s653_s1, 1536 }
 0x149   :  { %p472_p13 = scmp.ne.s32.totalorder %s653_s1, %s471_s27  ;;  %p475_p0 = scmp.lt.u32.totalorder %s471_s27, %s653_s1 }
 0x14b   :  { %p477_p1 = pnand %p475_p0, %p472_p13 }
 0x14d   :  { %480 = shalt.err (!%p477_p1)
}
 0x14e   :  { %423 = dma.vmem_to_hbm [thread:$0]  %s418_s23, 1536, %s653_s1, [#allocation6], %s486_s16, %s486_s16, %s487_s17  }
 0x14f   :  { %483 = dma.done.wait [#allocation6], 1536  }
 0x150   :  { %484 = vsyncadd [#allocation6], 4294965760 }
 0x151   :  { %427 = vsyncpa [#allocation5], 1 }
 0x152   :  { %428 = vsyncpa [#allocation6], 1 }

</bundles_post_ra>
